<compile_context>
chip_gen: v5e
topology: v5e:2x2
jax: 0.10.0
libtpu: 0.0.40
codegen_flags: <defaults>
</compile_context>

<pallas_src>
import functools

import jax
import jax.numpy as jnp
from jax.experimental import pallas as pl
from jax.experimental.pallas import tpu as pltpu

# ---- small synthetic config (original: S=512, E=768, F*len(fs)=96) -------------
BATCH        = 2
SEQ          = 16                  # sequence length
EMBED        = 32                  # embed_size
NUM_FILTERS  = 8                   # num_filters
FILTER_SIZES = (2, 3, 4)           # filter_sizes
NUM_CLASSES  = 5
FEAT_DIM     = NUM_FILTERS * len(FILTER_SIZES)    # fc2 out-dim (96 in original)
TOTF         = NUM_FILTERS * sum(FILTER_SIZES)    # fused conv-matmul width


def _pad128(n):
    return ((n + 127) // 128) * 128


FEAT_PAD     = _pad128(FEAT_DIM)   # lane-dense fc2 / hides width (128)
TOTF_PAD     = _pad128(TOTF)       # lane-dense fused conv width
PAD_C        = 128                 # lane-dense padded class dim
NUM_CORES    = 2                   # v7x: split the fc2 K stream over both TCs
TILE_BYTES   = 8 << 20             # per-buffer budget for the streamed bf16 w2 tile
                                   # (v6e/v5e with 128 MiB VMEM can raise this)


def _pick_k_tile(k_per_core, feat_pad, tile_bytes=TILE_BYTES, align=128):
    """Largest 128-aligned divisor of k_per_core whose bf16 w2 tile fits tile_bytes."""
    max_rows = max(align, tile_bytes // (feat_pad * 2))
    best = None
    t = align
    while t <= min(k_per_core, max_rows):
        if k_per_core % t == 0:
            best = t
        t += align
    if best is None:
        best = k_per_core                      # tiny K: single tile per core
    # keep at least 2 pipeline steps per core when it divides evenly (demo-scale nicety)
    if best == k_per_core and k_per_core % (2 * align) == 0:
        best = k_per_core // 2
    return best


def _textcnn_kernel(hidden_ref, w2_ref, sleeps_ref, wcat_ref, cb_ref, b2_ref,
                    wfc_ref, bfc_ref, out_ref, hides_acc, logits_acc,
                    *, k_tile, kt_per_core):
    n = pl.program_id(0)          # "parallel" axis: per-TensorCore slice of the K stream
    k = pl.program_id(1)          # "arbitrary" axis: fc2 contraction tiles
    F = NUM_FILTERS

    @pl.when(k == 0)
    def _init():
        hides_acc[...] = jnp.zeros_like(hides_acc)
        logits_acc[...] = jnp.zeros_like(logits_acc)

    # Conv + max-pool + pooled@wfc epilogue, hoisted to step 0 so it is hidden under
    # the mem-bound w2 DMA stream.  Only core n == 0 contributes it (no double count).
    @pl.when(jnp.logical_and(k == 0, n == 0))
    def _conv_pool():
        # constants folded through the final fc:  bfc + b2 @ wfc
        const = bfc_ref[...] + jnp.dot(b2_ref[...], wfc_ref[...],
                                       preferred_element_type=jnp.float32)    # (1, PAD_C)
        # Fused conv: ONE (B*S, E) @ (E, TOTF_PAD) MXU matmul covering every tap of
        # every filter size; per-filter outputs recovered by shifted adds on p.
        p = jnp.dot(sleeps_ref[...], wcat_ref[...],
                    preferred_element_type=jnp.float32)                        # (B*S, TOTF_PAD)

        acc = jnp.broadcast_to(const, (BATCH, PAD_C))
        col = 0
        for idx, fs in enumerate(FILTER_SIZES):
            s_out = SEQ - fs + 1
            rows = BATCH * SEQ - fs + 1
            # shifted adds vectorized over batch; rows past s_out-1 inside each batch
            # window would mix batches but are never read by the max slices below.
            q = p[0:rows, col:col + F]
            for i in range(1, fs):
                q = q + p[i:i + rows, col + i * F:col + (i + 1) * F]
            act = jnp.maximum(q + cb_ref[:, idx * F:(idx + 1) * F], 0.0)       # (rows, F)
            pooled = jnp.concatenate(
                [jnp.max(act[b * SEQ:b * SEQ + s_out, :], axis=0, keepdims=True)
                 for b in range(BATCH)], axis=0)                               # (B, F)
            # torch.cat + fc folded:  x @ wfc == sum_idx pooled_idx @ wfc_rows_idx
            acc = acc + jnp.dot(pooled, wfc_ref[idx * F:(idx + 1) * F, :],
                                preferred_element_type=jnp.float32)
            col += fs * F
        logits_acc[...] = acc

    # fc2 K-tile: hides_partial += hidden[:, tile] @ w2[tile, :]  (bf16 in, f32 acc).
    # hidden is resident; only w2 is streamed per grid step.
    koff = pl.multiple_of((n * kt_per_core + k) * k_tile, k_tile)
    hides_acc[...] += jnp.dot(hidden_ref[:, pl.ds(koff, k_tile)], w2_ref[...],
                              preferred_element_type=jnp.float32)

    @pl.when(k == pl.num_programs(1) - 1)
    def _finalize():
        # dropout: identity at inference (eval mode)
        out_ref[...] = logits_acc[...] + jnp.dot(hides_acc[...], wfc_ref[...],
                                                 preferred_element_type=jnp.float32)


def textcnn_forward(sleeps, cw, cb, w2, b2, wfc, bfc):
    B, S, E = sleeps.shape
    assert (B, S, E) == (BATCH, SEQ, EMBED)
    K = S * E
    assert K % NUM_CORES == 0
    k_per_core = K // NUM_CORES
    K_TILE = _pick_k_tile(k_per_core, FEAT_PAD)
    assert k_per_core % K_TILE == 0 and K_TILE % 8 == 0
    KT_PER_CORE = k_per_core // K_TILE

    # ---- host-side weight packing / padding / casts (once) ------------------------
    wcat = jnp.concatenate([cw[idx][i] for idx, fs in enumerate(FILTER_SIZES)
                            for i in range(fs)], axis=1)                        # (E, TOTF)
    wcat_pad = jnp.zeros((E, TOTF_PAD), jnp.bfloat16).at[:, :TOTF].set(
        wcat.astype(jnp.bfloat16))
    cb_pad = jnp.zeros((1, FEAT_PAD), jnp.float32).at[:, :FEAT_DIM].set(
        jnp.concatenate(cb, axis=1).astype(jnp.float32))
    w2_pad = jnp.zeros((K, FEAT_PAD), jnp.bfloat16).at[:, :FEAT_DIM].set(
        w2.astype(jnp.bfloat16))
    # TODO(synk): optional weight-only quantization of w2 (int8 on v5e/v6e, fp8 on v7x)
    #             would halve the dominant HBM stream; kept bf16 to preserve numerics.
    b2_pad = jnp.zeros((1, FEAT_PAD), jnp.float32).at[:, :FEAT_DIM].set(
        b2.astype(jnp.float32))
    wfc_pad = jnp.zeros((FEAT_PAD, PAD_C), jnp.float32).at[:FEAT_DIM, :NUM_CLASSES].set(wfc)
    bfc_pad = jnp.zeros((1, PAD_C), jnp.float32).at[:, :NUM_CLASSES].set(bfc)

    sleeps_bf = sleeps.astype(jnp.bfloat16)
    sleeps2d = sleeps_bf.reshape(B * S, E)       # conv operand (free collapse-reshape)
    hidden = sleeps_bf.reshape(B, K)             # fc2 operand (torch: sleeps.view(B,-1))

    def full_spec(a):
        # grid-invariant resident blocks.
        # TODO(synk): pipeline_mode=pl.Buffered(1) here would free a little VMEM on
        #             v7x; left at the default buffering for lowering robustness.
        return pl.BlockSpec(a.shape, lambda n, k, _nd=a.ndim: (0,) * _nd)

    in_specs = [
        full_spec(hidden),                                                     # resident
        pl.BlockSpec((K_TILE, FEAT_PAD), lambda n, k: (n * KT_PER_CORE + k, 0)),  # streamed w2
        full_spec(sleeps2d), full_spec(wcat_pad), full_spec(cb_pad),
        full_spec(b2_pad), full_spec(wfc_pad), full_spec(bfc_pad),
    ]
    out_spec = pl.BlockSpec((None, B, PAD_C), lambda n, k: (n, 0, 0))

    cost = pl.CostEstimate(
        flops=int(2 * B * K * FEAT_PAD + 2 * B * S * E * TOTF_PAD
                  + 4 * B * FEAT_PAD * PAD_C),
        transcendentals=0,
        bytes_accessed=int(K * FEAT_PAD * 2 + B * K * 2 + B * S * E * 2
                           + E * TOTF_PAD * 2 + FEAT_PAD * PAD_C * 4
                           + NUM_CORES * B * PAD_C * 4),
    )

    kernel = functools.partial(_textcnn_kernel, k_tile=K_TILE, kt_per_core=KT_PER_CORE)
    out = pl.pallas_call(
        kernel,
        out_shape=jax.ShapeDtypeStruct((NUM_CORES, B, PAD_C), jnp.float32),
        grid=(NUM_CORES, KT_PER_CORE),
        in_specs=in_specs,
        out_specs=out_spec,
        scratch_shapes=[pltpu.VMEM((B, FEAT_PAD), jnp.float32),   # hides partial acc
                        pltpu.VMEM((B, PAD_C), jnp.float32)],     # hoisted conv logits
        compiler_params=pltpu.CompilerParams(
            dimension_semantics=("parallel", "arbitrary"),
            vmem_limit_bytes=48 * 1024 * 1024),   # fits v7x (64 MiB/TC); v5e/v6e could raise
        cost_estimate=cost,
    )(hidden, w2_pad, sleeps2d, wcat_pad, cb_pad, b2_pad, wfc_pad, bfc_pad)

    # combine the per-core partial logits, drop class padding
    return jnp.sum(out, axis=0)[:, :NUM_CLASSES]                   # (B, NUM_CLASSES)


def reference_forward(sleeps, cw, cb, w2, b2, wfc, bfc):
    """Pure-JAX reference mirroring the PyTorch forward."""
    B = sleeps.shape[0]
    feats = []
    for idx, fs in enumerate(FILTER_SIZES):
        s_out = SEQ - fs + 1
        conv = jnp.zeros((B, s_out, NUM_FILTERS), jnp.float32)
        for i in range(fs):
            conv = conv + jnp.einsum('bse,ef->bsf', sleeps[:, i:i + s_out, :], cw[idx][i])
        conv = jax.nn.relu(conv + cb[idx])
        feats.append(conv.max(axis=1))
    x = jnp.concatenate(feats, axis=1)
    hides = sleeps.reshape(B, -1) @ w2 + b2
    x = x + hides
    return x @ wfc + bfc


if __name__ == "__main__":
    key = jax.random.PRNGKey(0)
    keys = jax.random.split(key, 11)

    def bf16_round(x):   # big operands are fed to the kernel in bf16; keep the
        return x.astype(jnp.bfloat16).astype(jnp.float32)   # reference on identical values

    cw, cb = [], []
    for idx, fs in enumerate(FILTER_SIZES):
        w_t = jax.random.normal(keys[idx], (NUM_FILTERS, 1, fs, EMBED), jnp.float32) * 0.1
        b_t = jax.random.normal(keys[3 + idx], (NUM_FILTERS,), jnp.float32) * 0.1
        cw.append(bf16_round(jnp.transpose(w_t[:, 0], (1, 2, 0))))   # (fs, E, F)
        cb.append(b_t.reshape(1, NUM_FILTERS))                       # (1, F)

    w2_t = jax.random.normal(keys[6], (FEAT_DIM, SEQ * EMBED), jnp.float32) * 0.05
    b2_t = jax.random.normal(keys[7], (FEAT_DIM,), jnp.float32) * 0.1
    w2 = bf16_round(w2_t.T)                                          # (S*E, FEAT_DIM)
    b2 = b2_t.reshape(1, FEAT_DIM)

    wfc_t = jax.random.normal(keys[8], (NUM_CLASSES, FEAT_DIM), jnp.float32) * 0.1
    bfc_t = jax.random.normal(keys[9], (NUM_CLASSES,), jnp.float32) * 0.1
    wfc = wfc_t.T                                                    # (FEAT_DIM, NUM_CLASSES)
    bfc = bfc_t.reshape(1, NUM_CLASSES)

    # Synthetic "BERT last_hidden_state" (the frozen encoder is not translated).
    sleeps = bf16_round(jax.random.normal(keys[10], (BATCH, SEQ, EMBED), jnp.float32))

    logits = textcnn_forward(sleeps, cw, cb, w2, b2, wfc, bfc)
    logits = jax.block_until_ready(logits)

    ref = reference_forward(sleeps, cw, cb, w2, b2, wfc, bfc)
    assert logits.shape == (BATCH, NUM_CLASSES)
    assert jnp.allclose(logits, ref, atol=1e-2, rtol=1e-2), (logits, ref)

    print("KERNEL_OK")
</pallas_src>

<mosaic_0001>
module attributes {stable_mosaic.version = 11 : i64} {
  func.func @_textcnn_kernel(%arg0: i32, %arg1: i32, %arg2: memref<2x512xbf16, #tpu.memory_space<vmem>>, %arg3: memref<128x128xbf16, #tpu.memory_space<vmem>>, %arg4: memref<32x32xbf16, #tpu.memory_space<vmem>>, %arg5: memref<32x128xbf16, #tpu.memory_space<vmem>>, %arg6: memref<1x128xf32, #tpu.memory_space<vmem>>, %arg7: memref<1x128xf32, #tpu.memory_space<vmem>>, %arg8: memref<128x128xf32, #tpu.memory_space<vmem>>, %arg9: memref<1x128xf32, #tpu.memory_space<vmem>>, %arg10: memref<1x2x128xf32, #tpu.memory_space<vmem>>, %arg11: memref<2x128xf32, #tpu.memory_space<vmem>>, %arg12: memref<2x128xf32, #tpu.memory_space<vmem>>) attributes {dimension_semantics = [#tpu.dimension_semantics<parallel>, #tpu.dimension_semantics<arbitrary>], iteration_bounds = array<i64: 2, 2>, scalar_prefetch = 0 : i64, scratch_operands = 2 : i64, tpu.core_type = #tpu.core_type<tc>, window_params = [{pipeline_mode = #tpu.pipeline_mode<synchronous>, transform_indices = @transform_0, window_bounds = array<i64: 2, 512>}, {transform_indices = @transform_1, window_bounds = array<i64: 128, 128>}, {pipeline_mode = #tpu.pipeline_mode<synchronous>, transform_indices = @transform_2, window_bounds = array<i64: 32, 32>}, {pipeline_mode = #tpu.pipeline_mode<synchronous>, transform_indices = @transform_3, window_bounds = array<i64: 32, 128>}, {pipeline_mode = #tpu.pipeline_mode<synchronous>, transform_indices = @transform_4, window_bounds = array<i64: 1, 128>}, {pipeline_mode = #tpu.pipeline_mode<synchronous>, transform_indices = @transform_5, window_bounds = array<i64: 1, 128>}, {pipeline_mode = #tpu.pipeline_mode<synchronous>, transform_indices = @transform_6, window_bounds = array<i64: 128, 128>}, {pipeline_mode = #tpu.pipeline_mode<synchronous>, transform_indices = @transform_7, window_bounds = array<i64: 1, 128>}, {transform_indices = @transform_8, window_bounds = array<i64: 1, 2, 128>}]} {
    %c0_i32 = arith.constant 0 : i32
    %0 = arith.cmpi eq, %arg1, %c0_i32 : i32
    %1 = arith.extui %0 : i1 to i32
    %c0_i32_0 = arith.constant 0 : i32
    %2 = arith.cmpi ne, %1, %c0_i32_0 : i32
    scf.if %2 {
      %cst_11 = arith.constant 0.000000e+00 : f32
      %22 = vector.broadcast %cst_11 : f32 to vector<2x128xf32>
      %c0_12 = arith.constant 0 : index
      %c0_13 = arith.constant 0 : index
      %23 = vector.load %arg11[%c0_12, %c0_13] : memref<2x128xf32, #tpu.memory_space<vmem>>, vector<2x128xf32>
      tpu.vector_store %arg11[%c0_12, %c0_13], %22 {strides = array<i32>} : memref<2x128xf32, #tpu.memory_space<vmem>>, vector<2x128xf32>,
      %cst_14 = arith.constant 0.000000e+00 : f32
      %24 = vector.broadcast %cst_14 : f32 to vector<2x128xf32>
      %c0_15 = arith.constant 0 : index
      %c0_16 = arith.constant 0 : index
      %25 = vector.load %arg12[%c0_15, %c0_16] : memref<2x128xf32, #tpu.memory_space<vmem>>, vector<2x128xf32>
      tpu.vector_store %arg12[%c0_15, %c0_16], %24 {strides = array<i32>} : memref<2x128xf32, #tpu.memory_space<vmem>>, vector<2x128xf32>,
    } else {
    }
    %c0_i32_1 = arith.constant 0 : i32
    %3 = arith.cmpi eq, %arg1, %c0_i32_1 : i32
    %c0_i32_2 = arith.constant 0 : i32
    %4 = arith.cmpi eq, %arg0, %c0_i32_2 : i32
    %5 = arith.andi %3, %4 : i1
    %6 = arith.extui %5 : i1 to i32
    %c0_i32_3 = arith.constant 0 : i32
    %7 = arith.cmpi ne, %6, %c0_i32_3 : i32
    scf.if %7 {
      %c0_11 = arith.constant 0 : index
      %c0_12 = arith.constant 0 : index
      %22 = vector.load %arg9[%c0_11, %c0_12] : memref<1x128xf32, #tpu.memory_space<vmem>>, vector<1x128xf32>
      %c0_13 = arith.constant 0 : index
      %c0_14 = arith.constant 0 : index
      %23 = vector.load %arg7[%c0_13, %c0_14] : memref<1x128xf32, #tpu.memory_space<vmem>>, vector<1x128xf32>
      %c0_15 = arith.constant 0 : index
      %c0_16 = arith.constant 0 : index
      %24 = vector.load %arg8[%c0_15, %c0_16] : memref<128x128xf32, #tpu.memory_space<vmem>>, vector<128x128xf32>
      %cst_17 = arith.constant dense<0.000000e+00> : vector<1x128xf32>
      %25 = tpu.matmul %23, %24, %cst_17 {dimension_numbers = #tpu.dot_dimension_numbers<[1], [0], [0], [1], [0, 0, 1, 1], [], []>} : vector<1x128xf32>, vector<128x128xf32>, vector<1x128xf32> -> vector<1x128xf32>
      %26 = arith.addf %22, %25 : vector<1x128xf32>
      %c0_18 = arith.constant 0 : index
      %c0_19 = arith.constant 0 : index
      %27 = vector.load %arg4[%c0_18, %c0_19] : memref<32x32xbf16, #tpu.memory_space<vmem>>, vector<32x32xbf16>
      %c0_20 = arith.constant 0 : index
      %c0_21 = arith.constant 0 : index
      %28 = vector.load %arg5[%c0_20, %c0_21] : memref<32x128xbf16, #tpu.memory_space<vmem>>, vector<32x128xbf16>
      %cst_22 = arith.constant dense<0.000000e+00> : vector<32x128xf32>
      %29 = tpu.matmul %27, %28, %cst_22 {dimension_numbers = #tpu.dot_dimension_numbers<[1], [0], [0], [1], [0, 0, 1, 1], [], []>} : vector<32x32xbf16>, vector<32x128xbf16>, vector<32x128xf32> -> vector<32x128xf32>
      %30 = vector.shape_cast %26 : vector<1x128xf32> to vector<1x128xf32>
      %31 = vector.broadcast %30 : vector<1x128xf32> to vector<2x128xf32>
      %32 = vector.extract_strided_slice %29 {offsets = [0, 0], sizes = [31, 8], strides = [1, 1]} : vector<32x128xf32> to vector<31x8xf32>
      %33 = vector.extract_strided_slice %29 {offsets = [1, 8], sizes = [31, 8], strides = [1, 1]} : vector<32x128xf32> to vector<31x8xf32>
      %34 = arith.addf %32, %33 : vector<31x8xf32>
      %c0_23 = arith.constant 0 : index
      %c0_24 = arith.constant 0 : index
      %35 = vector.load %arg6[%c0_23, %c0_24] : memref<1x128xf32, #tpu.memory_space<vmem>>, vector<1x8xf32>
      %36 = vector.broadcast %35 : vector<1x8xf32> to vector<31x8xf32>
      %37 = arith.addf %34, %36 : vector<31x8xf32>
      %cst_25 = arith.constant 0.000000e+00 : f32
      %38 = vector.broadcast %cst_25 : f32 to vector<31x8xf32>
      %39 = arith.maximumf %37, %38 : vector<31x8xf32>
      %40 = vector.extract_strided_slice %39 {offsets = [0, 0], sizes = [15, 8], strides = [1, 1]} : vector<31x8xf32> to vector<15x8xf32>
      %cst_26 = arith.constant dense<0xFF800000> : vector<8xf32>
      %41 = vector.multi_reduction <maximumf>, %40, %cst_26 [0] : vector<15x8xf32> to vector<8xf32>
      %42 = vector.shape_cast %41 : vector<8xf32> to vector<1x8xf32>
      %43 = vector.extract_strided_slice %39 {offsets = [16, 0], sizes = [15, 8], strides = [1, 1]} : vector<31x8xf32> to vector<15x8xf32>
      %cst_27 = arith.constant dense<0xFF800000> : vector<8xf32>
      %44 = vector.multi_reduction <maximumf>, %43, %cst_27 [0] : vector<15x8xf32> to vector<8xf32>
      %45 = vector.shape_cast %44 : vector<8xf32> to vector<1x8xf32>
      %46 = tpu.concatenate %42, %45 in 0 : vector<1x8xf32>, vector<1x8xf32> -> vector<2x8xf32>
      %c0_28 = arith.constant 0 : index
      %c0_29 = arith.constant 0 : index
      %47 = vector.load %arg8[%c0_28, %c0_29] : memref<128x128xf32, #tpu.memory_space<vmem>>, vector<8x128xf32>
      %cst_30 = arith.constant dense<0.000000e+00> : vector<2x128xf32>
      %48 = tpu.matmul %46, %47, %cst_30 {dimension_numbers = #tpu.dot_dimension_numbers<[1], [0], [0], [1], [0, 0, 1, 1], [], []>} : vector<2x8xf32>, vector<8x128xf32>, vector<2x128xf32> -> vector<2x128xf32>
      %49 = arith.addf %31, %48 : vector<2x128xf32>
      %50 = vector.extract_strided_slice %29 {offsets = [0, 16], sizes = [30, 8], strides = [1, 1]} : vector<32x128xf32> to vector<30x8xf32>
      %51 = vector.extract_strided_slice %29 {offsets = [1, 24], sizes = [30, 8], strides = [1, 1]} : vector<32x128xf32> to vector<30x8xf32>
      %52 = arith.addf %50, %51 : vector<30x8xf32>
      %53 = vector.extract_strided_slice %29 {offsets = [2, 32], sizes = [30, 8], strides = [1, 1]} : vector<32x128xf32> to vector<30x8xf32>
      %54 = arith.addf %52, %53 : vector<30x8xf32>
      %c0_31 = arith.constant 0 : index
      %c8 = arith.constant 8 : index
      %55 = vector.load %arg6[%c0_31, %c8] : memref<1x128xf32, #tpu.memory_space<vmem>>, vector<1x8xf32>
      %56 = vector.broadcast %55 : vector<1x8xf32> to vector<30x8xf32>
      %57 = arith.addf %54, %56 : vector<30x8xf32>
      %cst_32 = arith.constant 0.000000e+00 : f32
      %58 = vector.broadcast %cst_32 : f32 to vector<30x8xf32>
      %59 = arith.maximumf %57, %58 : vector<30x8xf32>
      %60 = vector.extract_strided_slice %59 {offsets = [0, 0], sizes = [14, 8], strides = [1, 1]} : vector<30x8xf32> to vector<14x8xf32>
      %cst_33 = arith.constant dense<0xFF800000> : vector<8xf32>
      %61 = vector.multi_reduction <maximumf>, %60, %cst_33 [0] : vector<14x8xf32> to vector<8xf32>
      %62 = vector.shape_cast %61 : vector<8xf32> to vector<1x8xf32>
      %63 = vector.extract_strided_slice %59 {offsets = [16, 0], sizes = [14, 8], strides = [1, 1]} : vector<30x8xf32> to vector<14x8xf32>
      %cst_34 = arith.constant dense<0xFF800000> : vector<8xf32>
      %64 = vector.multi_reduction <maximumf>, %63, %cst_34 [0] : vector<14x8xf32> to vector<8xf32>
      %65 = vector.shape_cast %64 : vector<8xf32> to vector<1x8xf32>
      %66 = tpu.concatenate %62, %65 in 0 : vector<1x8xf32>, vector<1x8xf32> -> vector<2x8xf32>
      %c8_35 = arith.constant 8 : index
      %c0_36 = arith.constant 0 : index
      %67 = vector.load %arg8[%c8_35, %c0_36] : memref<128x128xf32, #tpu.memory_space<vmem>>, vector<8x128xf32>
      %cst_37 = arith.constant dense<0.000000e+00> : vector<2x128xf32>
      %68 = tpu.matmul %66, %67, %cst_37 {dimension_numbers = #tpu.dot_dimension_numbers<[1], [0], [0], [1], [0, 0, 1, 1], [], []>} : vector<2x8xf32>, vector<8x128xf32>, vector<2x128xf32> -> vector<2x128xf32>
      %69 = arith.addf %49, %68 : vector<2x128xf32>
      %70 = vector.extract_strided_slice %29 {offsets = [0, 40], sizes = [29, 8], strides = [1, 1]} : vector<32x128xf32> to vector<29x8xf32>
      %71 = vector.extract_strided_slice %29 {offsets = [1, 48], sizes = [29, 8], strides = [1, 1]} : vector<32x128xf32> to vector<29x8xf32>
      %72 = arith.addf %70, %71 : vector<29x8xf32>
      %73 = vector.extract_strided_slice %29 {offsets = [2, 56], sizes = [29, 8], strides = [1, 1]} : vector<32x128xf32> to vector<29x8xf32>
      %74 = arith.addf %72, %73 : vector<29x8xf32>
      %75 = vector.extract_strided_slice %29 {offsets = [3, 64], sizes = [29, 8], strides = [1, 1]} : vector<32x128xf32> to vector<29x8xf32>
      %76 = arith.addf %74, %75 : vector<29x8xf32>
      %c0_38 = arith.constant 0 : index
      %c16 = arith.constant 16 : index
      %77 = vector.load %arg6[%c0_38, %c16] : memref<1x128xf32, #tpu.memory_space<vmem>>, vector<1x8xf32>
      %78 = vector.broadcast %77 : vector<1x8xf32> to vector<29x8xf32>
      %79 = arith.addf %76, %78 : vector<29x8xf32>
      %cst_39 = arith.constant 0.000000e+00 : f32
      %80 = vector.broadcast %cst_39 : f32 to vector<29x8xf32>
      %81 = arith.maximumf %79, %80 : vector<29x8xf32>
      %82 = vector.extract_strided_slice %81 {offsets = [0, 0], sizes = [13, 8], strides = [1, 1]} : vector<29x8xf32> to vector<13x8xf32>
      %cst_40 = arith.constant dense<0xFF800000> : vector<8xf32>
      %83 = vector.multi_reduction <maximumf>, %82, %cst_40 [0] : vector<13x8xf32> to vector<8xf32>
      %84 = vector.shape_cast %83 : vector<8xf32> to vector<1x8xf32>
      %85 = vector.extract_strided_slice %81 {offsets = [16, 0], sizes = [13, 8], strides = [1, 1]} : vector<29x8xf32> to vector<13x8xf32>
      %cst_41 = arith.constant dense<0xFF800000> : vector<8xf32>
      %86 = vector.multi_reduction <maximumf>, %85, %cst_41 [0] : vector<13x8xf32> to vector<8xf32>
      %87 = vector.shape_cast %86 : vector<8xf32> to vector<1x8xf32>
      %88 = tpu.concatenate %84, %87 in 0 : vector<1x8xf32>, vector<1x8xf32> -> vector<2x8xf32>
      %c16_42 = arith.constant 16 : index
      %c0_43 = arith.constant 0 : index
      %89 = vector.load %arg8[%c16_42, %c0_43] : memref<128x128xf32, #tpu.memory_space<vmem>>, vector<8x128xf32>
      %cst_44 = arith.constant dense<0.000000e+00> : vector<2x128xf32>
      %90 = tpu.matmul %88, %89, %cst_44 {dimension_numbers = #tpu.dot_dimension_numbers<[1], [0], [0], [1], [0, 0, 1, 1], [], []>} : vector<2x8xf32>, vector<8x128xf32>, vector<2x128xf32> -> vector<2x128xf32>
      %91 = arith.addf %69, %90 : vector<2x128xf32>
      %c0_45 = arith.constant 0 : index
      %c0_46 = arith.constant 0 : index
      %92 = vector.load %arg12[%c0_45, %c0_46] : memref<2x128xf32, #tpu.memory_space<vmem>>, vector<2x128xf32>
      tpu.vector_store %arg12[%c0_45, %c0_46], %91 {strides = array<i32>} : memref<2x128xf32, #tpu.memory_space<vmem>>, vector<2x128xf32>,
    } else {
    }
    %c2_i32 = arith.constant 2 : i32
    %8 = arith.muli %arg0, %c2_i32 : i32
    %9 = arith.addi %8, %arg1 : i32
    %c128_i32 = arith.constant 128 : i32
    %10 = arith.muli %9, %c128_i32 : i32
    %11 = tpu.assume_multiple %10, 128 : i32
    %c0 = arith.constant 0 : index
    %c0_4 = arith.constant 0 : index
    %12 = vector.load %arg11[%c0, %c0_4] : memref<2x128xf32, #tpu.memory_space<vmem>>, vector<2x128xf32>
    %c0_5 = arith.constant 0 : index
    %13 = arith.index_cast %11 : i32 to index
    %14 = vector.load %arg2[%c0_5, %13] : memref<2x512xbf16, #tpu.memory_space<vmem>>, vector<2x128xbf16>
    %c0_6 = arith.constant 0 : index
    %c0_7 = arith.constant 0 : index
    %15 = vector.load %arg3[%c0_6, %c0_7] : memref<128x128xbf16, #tpu.memory_space<vmem>>, vector<128x128xbf16>
    %cst = arith.constant dense<0.000000e+00> : vector<2x128xf32>
    %16 = tpu.matmul %14, %15, %cst {dimension_numbers = #tpu.dot_dimension_numbers<[1], [0], [0], [1], [0, 0, 1, 1], [], []>} : vector<2x128xbf16>, vector<128x128xbf16>, vector<2x128xf32> -> vector<2x128xf32>
    %17 = arith.addf %12, %16 : vector<2x128xf32>
    %c0_8 = arith.constant 0 : index
    %c0_9 = arith.constant 0 : index
    %18 = vector.load %arg11[%c0_8, %c0_9] : memref<2x128xf32, #tpu.memory_space<vmem>>, vector<2x128xf32>
    tpu.vector_store %arg11[%c0_8, %c0_9], %17 {strides = array<i32>} : memref<2x128xf32, #tpu.memory_space<vmem>>, vector<2x128xf32>,
    %c1_i32 = arith.constant 1 : i32
    %19 = arith.cmpi eq, %arg1, %c1_i32 : i32
    %20 = arith.extui %19 : i1 to i32
    %c0_i32_10 = arith.constant 0 : i32
    %21 = arith.cmpi ne, %20, %c0_i32_10 : i32
    scf.if %21 {
      %c0_11 = arith.constant 0 : index
      %c0_12 = arith.constant 0 : index
      %22 = vector.load %arg12[%c0_11, %c0_12] : memref<2x128xf32, #tpu.memory_space<vmem>>, vector<2x128xf32>
      %c0_13 = arith.constant 0 : index
      %c0_14 = arith.constant 0 : index
      %23 = vector.load %arg11[%c0_13, %c0_14] : memref<2x128xf32, #tpu.memory_space<vmem>>, vector<2x128xf32>
      %c0_15 = arith.constant 0 : index
      %c0_16 = arith.constant 0 : index
      %24 = vector.load %arg8[%c0_15, %c0_16] : memref<128x128xf32, #tpu.memory_space<vmem>>, vector<128x128xf32>
      %cst_17 = arith.constant dense<0.000000e+00> : vector<2x128xf32>
      %25 = tpu.matmul %23, %24, %cst_17 {dimension_numbers = #tpu.dot_dimension_numbers<[1], [0], [0], [1], [0, 0, 1, 1], [], []>} : vector<2x128xf32>, vector<128x128xf32>, vector<2x128xf32> -> vector<2x128xf32>
      %26 = arith.addf %22, %25 : vector<2x128xf32>
      %c0_18 = arith.constant 0 : index
      %c0_19 = arith.constant 0 : index
      %c0_20 = arith.constant 0 : index
      %27 = vector.load %arg10[%c0_18, %c0_19, %c0_20] : memref<1x2x128xf32, #tpu.memory_space<vmem>>, vector<1x2x128xf32>
      %28 = vector.shape_cast %27 : vector<1x2x128xf32> to vector<2x128xf32>
      %29 = vector.shape_cast %26 : vector<2x128xf32> to vector<1x2x128xf32>
      tpu.vector_store %arg10[%c0_18, %c0_19, %c0_20], %29 {strides = array<i32>} : memref<1x2x128xf32, #tpu.memory_space<vmem>>, vector<1x2x128xf32>,
    } else {
    }
    return
  }
  func.func @transform_0(%arg0: i32, %arg1: i32) -> (i32, i32) {
    %c0_i32 = arith.constant 0 : i32
    %c0_i32_0 = arith.constant 0 : i32
    %c0_i32_1 = arith.constant 0 : i32
    return %c0_i32, %c0_i32_0 : i32, i32
  }
  func.func @transform_1(%arg0: i32, %arg1: i32) -> (i32, i32) {
    %c2_i32 = arith.constant 2 : i32
    %0 = arith.muli %arg0, %c2_i32 : i32
    %1 = arith.addi %0, %arg1 : i32
    %c0_i32 = arith.constant 0 : i32
    %c0_i32_0 = arith.constant 0 : i32
    return %1, %c0_i32 : i32, i32
  }
  func.func @transform_2(%arg0: i32, %arg1: i32) -> (i32, i32) {
    %c0_i32 = arith.constant 0 : i32
    %c0_i32_0 = arith.constant 0 : i32
    %c0_i32_1 = arith.constant 0 : i32
    return %c0_i32, %c0_i32_0 : i32, i32
  }
  func.func @transform_3(%arg0: i32, %arg1: i32) -> (i32, i32) {
    %c0_i32 = arith.constant 0 : i32
    %c0_i32_0 = arith.constant 0 : i32
    %c0_i32_1 = arith.constant 0 : i32
    return %c0_i32, %c0_i32_0 : i32, i32
  }
  func.func @transform_4(%arg0: i32, %arg1: i32) -> (i32, i32) {
    %c0_i32 = arith.constant 0 : i32
    %c0_i32_0 = arith.constant 0 : i32
    %c0_i32_1 = arith.constant 0 : i32
    return %c0_i32, %c0_i32_0 : i32, i32
  }
  func.func @transform_5(%arg0: i32, %arg1: i32) -> (i32, i32) {
    %c0_i32 = arith.constant 0 : i32
    %c0_i32_0 = arith.constant 0 : i32
    %c0_i32_1 = arith.constant 0 : i32
    return %c0_i32, %c0_i32_0 : i32, i32
  }
  func.func @transform_6(%arg0: i32, %arg1: i32) -> (i32, i32) {
    %c0_i32 = arith.constant 0 : i32
    %c0_i32_0 = arith.constant 0 : i32
    %c0_i32_1 = arith.constant 0 : i32
    return %c0_i32, %c0_i32_0 : i32, i32
  }
  func.func @transform_7(%arg0: i32, %arg1: i32) -> (i32, i32) {
    %c0_i32 = arith.constant 0 : i32
    %c0_i32_0 = arith.constant 0 : i32
    %c0_i32_1 = arith.constant 0 : i32
    return %c0_i32, %c0_i32_0 : i32, i32
  }
  func.func @transform_8(%arg0: i32, %arg1: i32) -> (i32, i32, i32) {
    %c0_i32 = arith.constant 0 : i32
    %c0_i32_0 = arith.constant 0 : i32
    %c0_i32_1 = arith.constant 0 : i32
    return %arg0, %c0_i32, %c0_i32_0 : i32, i32, i32
  }
}

</mosaic_0001>

<bundles_post_ra>
// kernel: tpu_custom_call.1
= control target key start
LH: loop header
LB: loop body
LE: loop exit
PB: predicated region body
PF: predicated region fallthrough
CT: control target
= control target key end

     0   :  { %s1994_s0 = inlined_call_operand.hbm [shape: bf16[2,512], index: 0, kind: input, shape index: {}]   ;;  %s1995_s1 = inlined_call_operand.hbm [shape: bf16[512,128], index: 1, kind: input, shape index: {}]   ;;  %s1996_s2 = inlined_call_operand.hbm [shape: bf16[32,32], index: 2, kind: input, shape index: {}]   ;;  %s1997_s3 = inlined_call_operand.hbm [shape: bf16[32,128], index: 3, kind: input, shape index: {}]   ;;  %s1998_s4 = inlined_call_operand.vmem [shape: f32[1,128], index: 4, kind: input, shape index: {}]   ;;  %s1999_s5 = inlined_call_operand.vmem [shape: f32[1,128], index: 5, kind: input, shape index: {}]   ;;  %s2000_s6 = inlined_call_operand.hbm [shape: f32[128,128], index: 6, kind: input, shape index: {}]   ;;  %s2001_s7 = inlined_call_operand.vmem [shape: f32[1,128], index: 7, kind: input, shape index: {}]   ;;  %s2002_s8 = inlined_call_operand.hbm [shape: f32[2,2,128], index: 8, kind: output, shape index: {}]  }
   0x1   :  { %2016 = sst [smem:[#allocation26_spill]] %s1994_s0 }
   0x2   :  { %2017 = sst [smem:[#allocation27_spill]] %s1996_s2 }
   0x3   :  { %2018 = sst [smem:[#allocation28_spill]] %s1997_s3 }
   0x4   :  { %2019 = sst [smem:[#allocation29_spill]] %s1998_s4 }
   0x5   :  { %2020 = sst [smem:[#allocation30_spill]] %s1999_s5 }
   0x6   :  { %2021 = sst [smem:[#allocation31_spill]] %s2000_s6 }
   0x7   :  { %2022 = sst [smem:[#allocation32_spill]] %s2001_s7 }
   0x8   :  { %2023 = sst [smem:[#allocation33_spill]] %s2002_s8 }
   0x9   :  { %13 = vsyncpa [#allocation5], 0 }
   0xa   :  { %14 = vsyncpa [#allocation8], 0 }
   0xb   :  { %16 = vsyncpa [#allocation8 + $0x1], 0 }
   0xc   :  { %17 = vsyncpa [#allocation11], 0 }
   0xd   :  { %18 = vsyncpa [#allocation6], 0 }
   0xe   :  { %20 = vsyncpa [#allocation6 + $0x1], 0  ;;  %s1642_s27 = smov 0   ;;  %s1644_s28 = smov 0  }
   0xf   :  { %s1646_s29 = smov 0   ;;  %s1648_s30 = smov 0  }
  0x10   :  { %s1650_s9 = smov 0   ;;  %s1652_s10 = smov 0  }
  0x11   :  { %s1654_s11 = smov 0   ;;  %s1656_s12 = smov 0  }
  0x12   :  { %s1658_s13 = smov 0   ;;  %s1660_s14 = smov 0  }
  0x13   :  { %s1662_s15 = smov 0  }
  0x14 LB: > { %2024 = sst [smem:[#allocation19_spill]] %s1540_s27  ;;  %s1696_s16 = sadd.s32 4294967295, %s1580_s15   ;;  %s1580_s15 = sphi %s1662_s15, %s26_s15   ;;  %s1576_s14 = sphi %s1660_s14, %s2069_s14   ;;  %s1572_s13 = sphi %s1658_s13, %s2068_s13   ;;  %s1568_s12 = sphi %s1656_s12, %s2067_s12   ;;  %s1564_s11 = sphi %s1654_s11, %s2060_s11   ;;  %s1560_s10 = sphi %s1652_s10, %s2066_s10   ;;  %s1556_s9 = sphi %s1650_s9, %s2065_s9   ;;  %s1552_s30 = sphi %s1648_s30, %s2064_s30   ;;  %s1548_s29 = sphi %s1646_s29, %s2063_s29   ;;  %s1544_s28 = sphi %s1644_s28, %s2062_s28   ;;  %s1540_s27 = sphi %s1642_s27, %s2059_s27  }
  0x15   : > { %2025 = sst [smem:[#allocation20_spill]] %s1544_s28  ;;  %s1047_s17 = sadd.s32 4294967294, %s1580_s15  }
  0x16   : > { %2026 = sst [smem:[#allocation21_spill]] %s1564_s11  ;;  %p83_p0 = scmp.ne.s32.totalorder %s1556_s9, %s1552_s30 }
  0x17   : > { %2027 = sst [smem:[#allocation22_spill]] %s1568_s12  ;;  %p84_p1 = scmp.eq.s32.totalorder %s1696_s16, 0 }
  0x18   : > { %2028 = sst [smem:[#allocation23_spill]] %s1572_s13  ;;  %p232_p2 = scmp.ne.s32.totalorder %s1548_s29, %s1544_s28 }
  0x19   : > { %p1706_p3 = por %p84_p1, %p83_p0  ;;  %p233_p4 = scmp.eq.s32.totalorder %s1696_s16, 3 }
  0x1a   : > { %p238_p5 = scmp.ne.s32.totalorder %s1544_s28, %s1540_s27  ;;  %p239_p6 = scmp.eq.s32.totalorder %s1047_s17, 3 }
  0x1b   : > { %p1713_p7 = por %p233_p4, %p232_p2  ;;  %p1050_p8 = scmp.ge.s32.totalorder %s1580_s15, 1 }
  0x1c   : > { %p1718_p9 = por %p239_p6, %p238_p5  ;;  %p246_p10 = scmp.lt.s32.totalorder %s1580_s15, 5 }
  0x1d   : > { %s2030_s20 = scalar_select %p1713_p7, 1, 0 }
  0x1e   : > { %s2032_s21 = scalar_select %p1718_p9, 1, 0 }
  0x1f   : > { %2031 = sst [smem:[#allocation24_spill]] %s2030_s20  ;;  %p1726_p11 = pnand %p1050_p8, %p246_p10 }
  0x20   : > { %2033 = sst [smem:[#allocation25_spill]] %s2032_s21  ;;  %s1582_s26 = smov [#allocation9]  }
  0x21   : > { %s2034_s2 = sld [smem:[#allocation27_spill]]  ;;  %p1161_p12 = pneg %p1726_p11 }
  0x22   : > { %s271_s30 = sshll.u32 %s1582_s26, 4  ;;  %s2037_s3 = sld [smem:[#allocation28_spill]]  ;;  %s272_s30 = int_to_ptr.vmem [resolvable:$true] %s271_s30 }
  0x23   : > { %p1734_p13 = pnand %p1161_p12, %p84_p1  ;;  %s2008_s23 = smov 64  }
  0x24   : > { %s1585_s26 = smov [#allocation10]   ;;  %s2038_s0 = sld [smem:[#allocation26_spill]] }
  0x25   : > { %s285_s27 = sshll.u32 %s1585_s26, 4  ;;  %s1586_s20 = smov [#allocation4]   ;;  %s286_s27 = int_to_ptr.vmem [resolvable:$true] %s285_s27 }
  0x26   : > { %s2039_s6 = sld [smem:[#allocation31_spill]]  ;;  %s1588_s18 = smov 128  }
  0x27   : > { %s269_s24 = sshll.u32 %s2034_s2, 4  ;;  %s2009_s2 = smov 4   ;;  %s270_s24 = int_to_ptr.hbm [resolvable:$true] %s269_s24 }
  0x28   : > { %s283_s22 = sshll.u32 %s2037_s3, 4  ;;  %s35_s21 = sadd.s32 1, %s1572_s13  ;;  %s284_s22 = int_to_ptr.hbm [resolvable:$true] %s283_s22 }
  0x29   : > { %1167 = dma.hbm_to_vmem [thread:$0]  (!%p1734_p13), %s270_s24, 256, %s272_s30, [#allocation8], %s2008_s23, %s2008_s23, %s2009_s2  }
  0x2a   : > { %1170 = dma.hbm_to_vmem [thread:$0]  (!%p1734_p13), %s284_s22, 256, %s286_s27, [#allocation11], %s2008_s23, %s2008_s23, %s2009_s2  }
  0x2b   : > { %s258_s3 = sshll.u32 %s2038_s0, 4  ;;  %s260_s24 = sshll.u32 %s1586_s20, 4  ;;  %s259_s3 = int_to_ptr.hbm [resolvable:$true] %s258_s3  ;;  %s261_s24 = int_to_ptr.vmem [resolvable:$true] %s260_s24 }
  0x2c   : > { %s303_s8 = sshll.u32 %s2039_s6, 4  ;;  %s1587_s27 = smov [#allocation12]   ;;  %s304_s8 = int_to_ptr.hbm [resolvable:$true] %s303_s8 }
  0x2d   : > { %1164 = dma.hbm_to_vmem [thread:$0]  (!%p1734_p13), %s259_s3, 64, %s261_s24, [#allocation5]  }
  0x2e   : > { %s305_s22 = sshll.u32 %s1587_s27, 4  ;;  %s1589_s20 = smov 8   ;;  %s306_s22 = int_to_ptr.vmem [resolvable:$true] %s305_s22 }
  0x2f   : > { %1173 = dma.hbm_to_vmem [thread:$0]  (!%p1734_p13), %s304_s8, 2048, %s306_s22, [#allocation11], %s1588_s18, %s1588_s18, %s1589_s20  }
  0x30   : > { %s38_s30 = sadd.s32 1, %s1576_s14  ;;  %p36_p0 = scmp.ge.s32.totalorder %s35_s21, 2 }
  0x31   : > { %s1048_s26 = sshll.u32 %s1576_s14, 1  ;;  %s70_s24 = sadd.s32 1, %s1560_s10 }
  0x32   : > { %s64_s3 = sadd.s32 %s1572_s13, %s1048_s26  ;;  %s2071_s21 = smov (%p36_p0, %s35_s21), 0 }
  0x33   : > { %s2073_s30 = smov (!%p36_p0, %s38_s30), %s1576_s14  ;;  %p77_p2 = scmp.ne.s32.totalorder %s1560_s10, %s1556_s9 }
  0x34   : > { %p78_p4 = scmp.eq.s32.totalorder %s1580_s15, 0  ;;  %p40_p5 = scmp.ge.s32.totalorder %s2073_s30, 2 }
  0x35   : > { %p1186_p6 = scmp.lt.s32.totalorder %s1580_s15, 4  ;;  %s322_s17 = sand.u32 1, %s1580_s15  }
  0x36   : > { %p1773_p8 = por %p78_p4, %p77_p2  ;;  %s2075_s30 = smov (%p40_p5, %s2073_s30), 0 }
  0x37   : > { %s324_s27 = sand.u32 1, %s1560_s10   ;;  %s1049_s22 = sshll.u32 %s2075_s30, 1 }
  0x38   : > { %s219_s18 = ssub.s32 %s1576_s14, %s2075_s30  ;;  %s66_s20 = sadd.s32 %s1049_s22, %s2071_s21 }
  0x39   : > { %p220_p10 = scmp.eq.s32.totalorder %s219_s18, 0  ;;  %s67_s26 = ssub.s32 %s64_s3, %s66_s20 }
  0x3a   : > { %s1056_s23 = sshll.u32 %s324_s27, 6  ;;  %p68_p12 = scmp.eq.s32.totalorder %s67_s26, 0 }
  0x3b   : > { %s2041_s2 = sadd.s32 1, %s1548_s29  ;;  %s1128_s13 = sshll.u32 %s64_s3, 6 }
  0x3c   : > { %s1788_s0 = scalar_select %p220_p10, %s1548_s29, %s2041_s2  }
  0x3d   : > { %s1791_s6 = scalar_select %p68_p12, %s1560_s10, %s70_s24  }
  0x3e   : > { %s326_s7 = scalar_lea.vmem [#allocation7], %s1056_s23  ;;  %s333_s11 = scalar_lea.hbm %s1995_s1, %s1128_s13 }
  0x3f   : > { %s336_s5 = sshll.u32 %s326_s7, 4  ;;  %s334_s28 = sshll.u32 %s333_s11, 4  ;;  %s337_s5 = int_to_ptr.vmem [resolvable:$true] %s336_s5  ;;  %s335_s28 = int_to_ptr.hbm [resolvable:$true] %s334_s28 }
  0x40   : > { %p1175_p13 = pnand %p1186_p6, %p1773_p8  ;;  %s323_s27 = scalar_lea.sflag [#allocation8], %s322_s17 }
  0x41   : > { %s2042_s22 = smov 4   ;;  %s2043_s18 = smov 64  }
  0x42   : > { %1177 = dma.hbm_to_vmem [thread:$0]  (!%p1175_p13), %s335_s28, 1024, %s337_s5, %s323_s27, %s2043_s18, %s2043_s18, %s2042_s22  }
  0x43   : > { %348 = sbr.rel (%p1726_p11) target bundleno = 1032 (0x408), region = 52 }
  0x48   : > { %1519 = dma.done.wait (%p84_p1), [#allocation5], 64  }
  0x49   : > { %1521 = vsyncadd (%p84_p1), [#allocation5], 4294967232  ;;  %s355_s2 = sand.u32 1, %s1696_s16   ;;  %s357_s4 = sand.u32 1, %s1556_s9  }
  0x4a   : > { %s1062_s7 = sshll.u32 %s357_s4, 6  ;;  %s356_s11 = scalar_lea.sflag [#allocation8], %s355_s2 }
  0x4b   : > { %s1811_s12 = scalar_lea.vmem [#allocation7], %s1062_s7 }
  0x4c   : > { %1523 = dma.done.wait (%p1706_p3), %s356_s11, 1024  }
  0x4d   : > { %1525 = vsyncadd (%p1706_p3), %s356_s11, 4294966272 }
  0x4e   : > { %1527 = dma.done.wait (%p84_p1), [#allocation8], 256  }
  0x4f   : > { %1529 = vsyncadd (%p84_p1), [#allocation8], 4294967040 }
  0x50   : > { %1531 = dma.done.wait (%p84_p1), [#allocation11], 2304  }
  0x51   : > { %1533 = vsyncadd (%p84_p1), [#allocation11], 4294964992  ;;  %s2044_s5 = sld [smem:[#allocation20_spill]] }
  0x52   : > { %s2045_s28 = sld [smem:[#allocation21_spill]] }
  0x57   : > { %s405_s13 = sand.u32 1, %s2044_s5  }
  0x58   : > { %p412_p11 = scmp.eq.s32.totalorder %s2045_s28, 0  ;;  %s1829_s19 = sshll.u32 %s405_s13, 1 }
  0x59   : > { %s407_s25 = scalar_lea.vmem [#allocation13], %s1829_s19  ;;  %p1067_p3 = scmp.ne.s32.totalorder %s2045_s28, 0 }
  0x5b   : > { %415 = sbr.rel (%p1067_p3) target bundleno = 99 (0x63), region = 76 }
  0x60   : > { %v1590_v0 = vmov 0.0  }
  0x61   : > { %416 = vst [vmem:[#allocation2] sm:$0x3] %v1590_v0 }
  0x62   : > { %417 = vst [vmem:[#allocation3] sm:$0x3] %v1590_v0 }
  0x63 PF: > { %s2046_s23 = sld [smem:[#allocation22_spill]] }
  0x69   : > { %p418_p0 = scmp.eq.s32.totalorder %s2046_s23, 0 }
  0x6b   : > { %p419_p1 = pnand %p418_p0, %p412_p11 }
  0x6c   : > { %s2047_s24 = sld [smem:[#allocation29_spill]] (!%p419_p1)  ;;  %s1591_s8 = smov (!%p419_p1), 8  }
  0x6d   : > { %422 = sbr.rel (%p419_p1) target bundleno = 685 (0x2ad), region = 80  ;;  %s1592_s17 = smov (!%p419_p1), 112  }
  0x6e   : > { %s1593_s20 = smov (!%p419_p1), 120   ;;  %s1594_s26 = smov (!%p419_p1), 104  }
  0x6f   : > { %s1595_s27 = smov (!%p419_p1), 24   ;;  %s2048_s2 = sld [smem:[#allocation30_spill]] (!%p419_p1) }
  0x70   : > { %s1596_s4 = smov (!%p419_p1), 88   ;;  %s2049_s5 = sld [smem:[#allocation32_spill]] (!%p419_p1) }
  0x72   : > { %v1132_v1 = vld [vmem:[#allocation10 + $0x8] sm:$0xff]  ;;  %v1131_v2 = vld [vmem:[#allocation10] sm:$0xff]  ;;  %v1129_v3 = vld [vmem:[#allocation9] sm:$0xff]  ;;  %vm492_vm0 = vcmask 261120   ;;  %vm608_vm1 = vcmask 1045504   ;;  %vm525_vm2 = vcmask 1046528  }
  0x73   : > { %505 = vmatpush.bf16.msra.mxu1 %v1132_v1  ;;  %v1130_v4 = vld [vmem:[#allocation9 + $0x8] sm:$0xff]  ;;  %v1837_v5 = vld [vmem:[%s2047_s24] ss:$0 sm:$0xff]  ;;  %vm691_vm3 = vcmask 1044480   ;;  %v439_v32 = vld [vmem:[#allocation12 + $0x70] sm:$0xff]  ;;  %vm563_vm4 = vcmask 63488  }
  0x74   : > { %632 = vrot.lane.b32.xlu2 %v1837_v5, %s1591_s8  ;;  %v440_v31 = vld [vmem:[#allocation12 + $0x78] sm:$0xff]  ;;  %v438_v34 = vld [vmem:[#allocation12 + $0x68] sm:$0xff]  ;;  %v437_v36 = vld [vmem:[#allocation12 + $0x60] sm:$0xff]  ;;  %vm645_vm5 = vcmask 193664   ;;  %vm561_vm6 = vcmask 64512   ;;  %vm643_vm7 = vcmask 195712  }
  0x75   : > { %441 = vmatpush.msra.mxu0 %v440_v31  ;;  %v436_v37 = vld [vmem:[#allocation12 + $0x58] sm:$0xff]  ;;  %v435_v38 = vld [vmem:[#allocation12 + $0x50] sm:$0xff]  ;;  %v434_v39 = vld [vmem:[#allocation12 + $0x48] sm:$0xff]  ;;  %vm726_vm8 = vcmask 392512   ;;  %vm728_vm9 = vcmask 389440   ;;  %vm581_vm10 = vcmask 1040384  }
  0x76   : > { %v433_v43 = vld [vmem:[#allocation12 + $0x40] sm:$0xff]  ;;  %v432_v44 = vld [vmem:[#allocation12 + $0x38] sm:$0xff]  ;;  %v431_v46 = vld [vmem:[#allocation12 + $0x30] sm:$0xff] }
  0x77   : > { %506 = vmatpush.bf16.msra.mxu1 %v1131_v2  ;;  %442 = vmatpush.msra.mxu0 %v439_v32  ;;  %v430_v47 = vld [vmem:[#allocation12 + $0x28] sm:$0xff]  ;;  %v429_v51 = vld [vmem:[#allocation12 + $0x20] sm:$0xff]  ;;  %v428_v55 = vld [vmem:[#allocation12 + $0x18] sm:$0xff] }
  0x78   : > { %v427_v59 = vld [vmem:[#allocation12 + $0x10] sm:$0xff]  ;;  %v426_v60 = vld [vmem:[#allocation12 + $0x8] sm:$0xff]  ;;  %v583_v61 = vld [vmem:[#allocation12] sm:$0xff] }
  0x79   : > { %443 = vmatpush.msra.mxu0 %v438_v34  ;;  %602 = vmatpush.msra.mxu2 %v583_v61 }
  0x7a   : > { %1084 = vmatmul.msk.bf16.vlgmr.msra.gmra.mxu1 %vm492_vm0, %v1129_v3  ;;  %685 = vmatpush.msra.mxu3 %v426_v60 }
  0x7b   : > { %444 = vmatpush.msra.mxu0 %v437_v36  ;;  %768 = vmatpush.msrb.mxu2 %v427_v59 }
  0x7d   : > { %445 = vmatpush.msra.mxu0 %v436_v37 }
  0x7f   : > { %446 = vmatpush.msra.mxu0 %v435_v38 }
  0x81   : > { %447 = vmatpush.msra.mxu0 %v434_v39 }
  0x83   : > { %448 = vmatpush.msra.mxu0 %v433_v43 }
  0x85   : > { %449 = vmatpush.msra.mxu0 %v432_v44 }
  0x87   : > { %450 = vmatpush.msra.mxu0 %v431_v46 }
  0x89   : > { %451 = vmatpush.msra.mxu0 %v430_v47 }
  0x8a   : > { %1085 = vmatmul.msk.bf16.gmra.mxu1 %vm492_vm0, %v1130_v4 }
  0x8b   : > { %452 = vmatpush.msra.mxu0 %v429_v51 }
  0x8d   : > { %453 = vmatpush.msra.mxu0 %v428_v55 }
  0x8f   : > { %454 = vmatpush.msra.mxu0 %v427_v59 }
  0x91   : > { %455 = vmatpush.msra.mxu0 %v426_v60 }
  0x93   : > { %456 = vmatpush.msra.mxu0 %v583_v61 }
  0xce   : > { %v1878_v33 = vpop.permute.xlu2 %632 }
  0xf7   : > { %v1840_v6 = vpop.f32.mrf.mxu1 }
  0xf8   : > { %v609_v8 = vrot.slane %v1840_v6, 2  ;;  %v526_v10 = vrot.slane %v1840_v6, 1  ;;  %v692_v16 = vrot.slane %v1840_v6, 3 }
  0xff   : > { %v1842_v7 = vpop.f32.mrf.mxu1 }
 0x100   : > { %v610_v9 = vrot.slane %v1842_v7, 2  ;;  %v527_v11 = vrot.slane %v1842_v7, 1  ;;  %v693_v14 = vrot.slane %v1842_v7, 3 }
 0x102   : > { %v611_v12 = vsel %vm608_vm1, %v609_v8, %v610_v9  ;;  %v528_v13 = vsel %vm525_vm2, %v526_v10, %v527_v11  ;;  %v694_v19 = vsel %vm691_vm3, %v692_v16, %v693_v14 }
 0x103   : > { %616 = vrot.lane.b32.xlu2 %v611_v12, %s1592_s17  ;;  %533 = vrot.lane.b32.xlu0 %v528_v13, %s1593_s20 }
 0x107   : > { %v1853_v15 = vpop.f32.mrf.mxu1 }
 0x108   : > { %v612_v17 = vrot.slane %v1853_v15, 2  ;;  %v695_v18 = vrot.slane %v1853_v15, 3  ;;  %v529_v22 = vrot.slane %v1853_v15, 1 }
 0x10a   : > { %v696_v20 = vsel %vm691_vm3, %v693_v14, %v695_v18  ;;  %v613_v21 = vsel %vm608_vm1, %v610_v9, %v612_v17  ;;  %v530_v26 = vsel %vm525_vm2, %v527_v11, %v529_v22 }
 0x10b   : > { %699 = vrot.lane.b32.xlu0 %v694_v19, %s1594_s26  ;;  %701 = vrot.lane.b32.xlu1 %v696_v20, %s1594_s26 }
 0x10c   : > { %618 = vrot.lane.b32.xlu2 %v613_v21, %s1592_s17 }
 0x10f   : > { %v1863_v23 = vpop.f32.mrf.mxu1 }
 0x110   : > { %v531_v24 = vrot.slane %v1863_v23, 1  ;;  %v697_v25 = vrot.slane %v1863_v23, 3  ;;  %v614_v28 = vrot.slane %v1863_v23, 2 }
 0x112   : > { %v698_v27 = vsel %vm691_vm3, %v695_v18, %v697_v25  ;;  %v615_v29 = vsel %vm608_vm1, %v612_v17, %v614_v28  ;;  %v532_v30 = vsel %vm525_vm2, %v529_v22, %v531_v24 }
 0x113   : > { %535 = vrot.lane.b32.xlu0 %v530_v26, %s1593_s20  ;;  %539 = vrot.lane.b32.xlu1 %v531_v24, %s1593_s20 }
 0x114   : > { %703 = vrot.lane.b32.xlu2 %v698_v27, %s1594_s26 }
 0x11b   : > { %620 = vrot.lane.b32.xlu0 %v615_v29, %s1592_s17  ;;  %622 = vrot.lane.b32.xlu1 %v614_v28, %s1592_s17 }
 0x123   : > { %705 = vrot.lane.b32.xlu0 %v697_v25, %s1594_s26  ;;  %537 = vrot.lane.b32.xlu1 %v532_v30, %s1593_s20 }
 0x12b   : > { %715 = vrot.lane.b32.xlu1 %v1837_v5, %s1595_s27 }
 0x15d   : > { %v617_v40 = vpop.permute.xlu2 %616 }
 0x166   : > { %v619_v53 = vpop.permute.xlu2 %618 }
 0x16e   : > { %v704_v31 = vpop.permute.xlu2 %703 }
 0x175   : > { %v534_v35 = vpop.permute.xlu0 %533 }
 0x176   : > { %v545_v45 = vadd.f32 %v534_v35, %v1840_v6 }
 0x178   : > { %v628_v48 = vadd.f32 %v617_v40, %v545_v45  ;;  %v553_v54 = vadd.f32 %v1837_v5, %v545_v45 }
 0x17a   : > { %v635_v56 = vadd.f32 %v1878_v33, %v628_v48  ;;  %v557_v0 = vmax.f32 %v553_v54, 0.0 }
 0x17c   : > { %v639_v1 = vmax.f32 %v635_v56, 0.0  ;;  %v562_v8 = vsel %vm561_vm6, %v557_v0, -inf }
 0x17d   : > { %v1880_v41 = vpop.permute.xlu0 %699  ;;  %v1882_v42 = vpop.permute.xlu1 %701 }
 0x17e   : > { %v644_v10 = vsel %vm643_vm7, %v639_v1, -inf  ;;  %v711_v32 = vadd.f32 %v1880_v41, %v628_v48 }
 0x185   : > { %v536_v49 = vpop.permute.xlu0 %535  ;;  %v540_v50 = vpop.permute.xlu1 %539 }
 0x186   : > { %v546_v52 = vadd.f32 %v536_v49, %v1842_v7  ;;  %v424_v7 = vld [vmem:[%s2048_s2] sm:$0x1]  ;;  %v548_v9 = vadd.f32 %v540_v50, %v1863_v23 }
 0x187   : > { %457 = vmatmul.f32.vlgmr.msra.gmra.mxu0 %v424_v7 }
 0x188   : > { %v554_v57 = vadd.f32 %v1837_v5, %v546_v52  ;;  %v629_v58 = vadd.f32 %v619_v53, %v546_v52  ;;  %v556_v16 = vadd.f32 %v1837_v5, %v548_v9 }
 0x18a   : > { %v558_v62 = vmax.f32 %v554_v57, 0.0  ;;  %v636_v63 = vadd.f32 %v1878_v33, %v629_v58  ;;  %v560_v22 = vmax.f32 %v556_v16, 0.0  ;;  %v712_v34 = vadd.f32 %v1882_v42, %v629_v58 }
 0x18c   : > { %v640_v2 = vmax.f32 %v636_v63, 0.0  ;;  %v564_v3 = vsel %vm563_vm4, %v558_v62, -inf  ;;  %v573_v35 = vsel %vm563_vm4, %v560_v22, -inf }
 0x18d   : > { %v623_v4 = vpop.permute.xlu1 %622  ;;  %v565_v11 = vmax.f32 %v562_v8, %v564_v3  ;;  %v621_v12 = vpop.permute.xlu0 %620 }
 0x18e   : > { %v646_v6 = vsel %vm645_vm5, %v640_v2, -inf  ;;  %v631_v14 = vadd.f32 %v623_v4, %v548_v9 }
 0x18f   : > { %v647_v13 = vmax.f32 %v644_v10, %v646_v6  ;;  %v566_v17 = vrot.slane %v565_v11, 4 }
 0x190   : > { %v638_v19 = vadd.f32 %v1878_v33, %v631_v14 }
 0x191   : > { %v648_v18 = vrot.slane %v647_v13, 4  ;;  %v567_v24 = vmax.f32 %v565_v11, %v566_v17 }
 0x192   : > { %v642_v27 = vmax.f32 %v638_v19, 0.0 }
 0x193   : > { %v649_v26 = vmax.f32 %v647_v13, %v648_v18 }
 0x194   : > { %v655_v38 = vsel %vm645_vm5, %v642_v27, -inf }
 0x195   : > { %v538_v20 = vpop.permute.xlu1 %537  ;;  %v706_v28 = vpop.permute.xlu0 %705  ;;  %v650_v44 = vrot.slane %v649_v26, 2 }
 0x196   : > { %v547_v21 = vadd.f32 %v538_v20, %v1853_v15  ;;  %v568_v15 = vrot.slane %v567_v24, 2  ;;  %v714_v39 = vadd.f32 %v706_v28, %v631_v14 }
 0x197   : > { %v651_v59 = vmax.f32 %v649_v26, %v650_v44 }
 0x198   : > { %v555_v23 = vadd.f32 %v1837_v5, %v547_v21  ;;  %v630_v25 = vadd.f32 %v621_v12, %v547_v21  ;;  %v569_v55 = vmax.f32 %v567_v24, %v568_v15 }
 0x199   : > { %v652_v9 = vrot.slane %v651_v59, 1 }
 0x19a   : > { %v559_v29 = vmax.f32 %v555_v23, 0.0  ;;  %v637_v30 = vadd.f32 %v1878_v33, %v630_v25  ;;  %v713_v5 = vadd.f32 %v704_v31, %v630_v25  ;;  %v570_v2 = vrot.slane %v569_v55, 1  ;;  %v423_v31 = vld [vmem:[%s2049_s5] sm:$0x1] }
 0x19b   : > { %v653_v19 = vmax.f32 %v651_v59, %v652_v9 }
 0x19c   : > { %v572_v36 = vsel %vm561_vm6, %v559_v29, -inf  ;;  %v641_v37 = vmax.f32 %v637_v30, 0.0  ;;  %v571_v12 = vmax.f32 %v569_v55, %v570_v2 }
 0x19d   : > { %v574_v40 = vmax.f32 %v572_v36, %v573_v35  ;;  %v716_v43 = vpop.permute.xlu1 %715 }
 0x19e   : > { %v654_v33 = vsel %vm643_vm7, %v641_v37, -inf  ;;  %v718_v45 = vadd.f32 %v716_v43, %v711_v32  ;;  %v719_v41 = vadd.f32 %v716_v43, %v712_v34  ;;  %v720_v46 = vadd.f32 %v716_v43, %v713_v5 }
 0x19f   : > { %v575_v42 = vrot.slane %v574_v40, 4  ;;  %v656_v47 = vmax.f32 %v654_v33, %v655_v38  ;;  %v721_v48 = vadd.f32 %v716_v43, %v714_v39 }
 0x1a0   : > { %v722_v49 = vmax.f32 %v718_v45, 0.0  ;;  %v723_v50 = vmax.f32 %v719_v41, 0.0  ;;  %v724_v51 = vmax.f32 %v720_v46, 0.0 }
 0x1a1   : > { %v576_v52 = vmax.f32 %v574_v40, %v575_v42  ;;  %v657_v53 = vrot.slane %v656_v47, 4  ;;  %v725_v54 = vmax.f32 %v721_v48, 0.0 }
 0x1a2   : > { %v727_v56 = vsel %vm726_vm8, %v722_v49, -inf  ;;  %v729_v57 = vsel %vm728_vm9, %v723_v50, -inf  ;;  %v737_v58 = vsel %vm726_vm8, %v724_v51, -inf }
 0x1a3   : > { %v577_v60 = vrot.slane %v576_v52, 2  ;;  %v658_v61 = vmax.f32 %v656_v47, %v657_v53  ;;  %v730_v62 = vmax.f32 %v727_v56, %v729_v57  ;;  %v738_v63 = vsel %vm728_vm9, %v725_v54, -inf }
 0x1a4   : > { %v739_v0 = vmax.f32 %v737_v58, %v738_v63 }
 0x1a5   : > { %v731_v1 = vrot.slane %v730_v62, 4  ;;  %v578_v3 = vmax.f32 %v576_v52, %v577_v60  ;;  %v659_v4 = vrot.slane %v658_v61, 2 }
 0x1a6   : > { %v740_v6 = vrot.slane %v739_v0, 4 }
 0x1a7   : > { %v732_v7 = vmax.f32 %v730_v62, %v731_v1  ;;  %v579_v8 = vrot.slane %v578_v3, 1  ;;  %v660_v10 = vmax.f32 %v658_v61, %v659_v4 }
 0x1a8   : > { %v741_v11 = vmax.f32 %v739_v0, %v740_v6 }
 0x1a9   : > { %v580_v13 = vmax.f32 %v578_v3, %v579_v8  ;;  %v661_v14 = vrot.slane %v660_v10, 1  ;;  %v733_v16 = vrot.slane %v732_v7, 2 }
 0x1aa   : > { %v742_v17 = vrot.slane %v741_v11, 2 }
 0x1ab   : > { %v582_v18 = vsel %vm581_vm10, %v571_v12, %v580_v13  ;;  %v662_v20 = vmax.f32 %v660_v10, %v661_v14  ;;  %v734_v21 = vmax.f32 %v732_v7, %v733_v16 }
 0x1ac   : > { %1086 = vmatmul.msk.f32.vlgmr.msra.gmra.mxu2 %vm561_vm6, %v582_v18  ;;  %v743_v22 = vmax.f32 %v741_v11, %v742_v17 }
 0x1ad   : > { %v663_v24 = vsel %vm581_vm10, %v653_v19, %v662_v20  ;;  %v735_v23 = vrot.slane %v734_v21, 1 }
 0x1ae   : > { %666 = vrot.lane.b32.xlu2 %v663_v24, %s1592_s17  ;;  %v744_v25 = vrot.slane %v743_v22, 1 }
 0x1af   : > { %v736_v26 = vmax.f32 %v734_v21, %v735_v23 }
 0x1b0   : > { %v745_v27 = vmax.f32 %v743_v22, %v744_v25 }
 0x1b2   : > { %v746_v28 = vsel %vm581_vm10, %v736_v26, %v745_v27 }
 0x1b3   : > { %749 = vrot.lane.b32.xlu0 %v746_v28, %s1596_s4 }
 0x204   : > { %v458_v32 = vpop.f32.mrf.mxu0 }
 0x205   : > { %v461_v34 = vadd.f32 %v458_v32, %v423_v31 }
 0x207   : > { %v519_v15 = vperm.slane %v461_v34, 0 }
 0x208   : > { %v667_v29 = vpop.permute.xlu2 %666 }
 0x209   : > { %1087 = vmatmul.msk.f32.vlgmr.msra.gmra.mxu3 %vm561_vm6, %v667_v29 }
 0x225   : > { %v750_v30 = vpop.permute.xlu0 %749 }
 0x226   : > { %1088 = vmatmul.msk.f32.vlgmr.msrb.gmra.mxu2 %vm561_vm6, %v750_v30 }
 0x22f   : > { %v604_v35 = vpop.f32.mrf.mxu2 }
 0x230   : > { %v607_v37 = vadd.f32 %v604_v35, %v519_v15 }
 0x28c   : > { %v687_v36 = vpop.f32.mrf.mxu3 }
 0x28d   : > { %v690_v5 = vadd.f32 %v687_v36, %v607_v37 }
 0x2a9   : > { %v770_v38 = vpop.f32.mrf.mxu2 }
 0x2aa   : > { %v773_v39 = vadd.f32 %v770_v38, %v690_v5 }
 0x2ac   : > { %774 = vst [vmem:[#allocation3] sm:$0x3] %v773_v39 }
 0x2ad PF: > { %s2050_s28 = sld [smem:[#allocation22_spill]]  ;;  %v1140_v40 = vld [vmem:[%s1811_s12 + $0x38] sm:$0xff]  ;;  %v1139_v43 = vld [vmem:[%s1811_s12 + $0x30] sm:$0xff]  ;;  %v1138_v44 = vld [vmem:[%s1811_s12 + $0x28] sm:$0xff] }
 0x2ae   : > { %s2051_s23 = sld [smem:[#allocation21_spill]]  ;;  %847 = vmatpush.bf16.msra.mxu0 %v1140_v40  ;;  %v1137_v33 = vld [vmem:[%s1811_s12 + $0x20] sm:$0xff]  ;;  %v1136_v45 = vld [vmem:[%s1811_s12 + $0x18] sm:$0xff]  ;;  %v1135_v41 = vld [vmem:[%s1811_s12 + $0x10] sm:$0xff] }
 0x2af   : > { %v1134_v46 = vld [vmem:[%s1811_s12 + $0x8] sm:$0xff]  ;;  %v1133_v42 = vld [vmem:[%s1811_s12] sm:$0xff]  ;;  %v778_v48 = vld [vmem:[#allocation2] sm:$0x3] }
 0x2b2   : > { %848 = vmatpush.bf16.msra.mxu0 %v1139_v43 }
 0x2b3   : > { %s1089_s16 = sshll.u32 %s2050_s28, 1 }
 0x2b4   : > { %s776_s3 = sadd.s32 %s2051_s23, %s1089_s16  ;;  %p1123_p2 = scmp.ne.s32.totalorder %s2051_s23, 1 }
 0x2b5   : > { %s1090_s24 = sshll.u32 %s776_s3, 7 }
 0x2b6   : > { %849 = vmatpush.bf16.msra.mxu0 %v1138_v44  ;;  %s779_s8 = sshra.s32 %s1090_s24, 7 }
 0x2b7   : > { %s781_s17 = scalar_lea.vmem [#allocation4], %s779_s8 }
 0x2b8   : > { %v782_v47 = vld [vmem:[%s781_s17] sm:$0x1] }
 0x2ba   : > { %850 = vmatpush.bf16.msra.mxu0 %v1137_v33 }
 0x2be   : > { %851 = vmatpush.bf16.msra.mxu0 %v1136_v45 }
 0x2c2   : > { %852 = vmatpush.bf16.msra.mxu0 %v1135_v41 }
 0x2c6   : > { %853 = vmatpush.bf16.msra.mxu0 %v1134_v46 }
 0x2ca   : > { %854 = vmatpush.bf16.msra.mxu0 %v1133_v42 }
 0x2cd   : > { %855 = vmatmul.bf16.vlgmr.msra.gmra.mxu0 %v782_v47 }
 0x34a   : > { %v856_v49 = vpop.f32.mrf.mxu0 }
 0x34b   : > { %v860_v50 = vadd.f32 %v856_v49, %v778_v48 }
 0x34d   : > { %861 = vst [vmem:[#allocation2] sm:$0x3] %v860_v50 }
 0x34e   : > { %865 = sbr.rel (%p1123_p2) target bundleno = 1012 (0x3f4), region = 84 }
 0x352   : > { %v858_v51 = vpop.f32.mrf.mxu0 }
 0x353   : > { %v883_v52 = vld [vmem:[#allocation12 + $0x78] sm:$0xff]  ;;  %v882_v53 = vld [vmem:[#allocation12 + $0x70] sm:$0xff]  ;;  %v881_v54 = vld [vmem:[#allocation12 + $0x68] sm:$0xff] }
 0x354   : > { %884 = vmatpush.msra.mxu0 %v883_v52  ;;  %v880_v55 = vld [vmem:[#allocation12 + $0x60] sm:$0xff]  ;;  %v879_v56 = vld [vmem:[#allocation12 + $0x58] sm:$0xff]  ;;  %v878_v57 = vld [vmem:[#allocation12 + $0x50] sm:$0xff] }
 0x355   : > { %v877_v58 = vld [vmem:[#allocation12 + $0x48] sm:$0xff]  ;;  %v876_v59 = vld [vmem:[#allocation12 + $0x40] sm:$0xff]  ;;  %v875_v60 = vld [vmem:[#allocation12 + $0x38] sm:$0xff] }
 0x356   : > { %885 = vmatpush.msra.mxu0 %v882_v53  ;;  %v874_v61 = vld [vmem:[#allocation12 + $0x30] sm:$0xff]  ;;  %v873_v62 = vld [vmem:[#allocation12 + $0x28] sm:$0xff]  ;;  %v872_v63 = vld [vmem:[#allocation12 + $0x20] sm:$0xff] }
 0x357   : > { %v871_v0 = vld [vmem:[#allocation12 + $0x18] sm:$0xff]  ;;  %v870_v1 = vld [vmem:[#allocation12 + $0x10] sm:$0xff]  ;;  %v869_v2 = vld [vmem:[#allocation12 + $0x8] sm:$0xff] }
 0x358   : > { %886 = vmatpush.msra.mxu0 %v881_v54  ;;  %v868_v3 = vld [vmem:[#allocation12] sm:$0xff]  ;;  %v867_v4 = vld [vmem:[#allocation2] sm:$0x3]  ;;  %v866_v6 = vld [vmem:[#allocation3] sm:$0x3] }
 0x35a   : > { %887 = vmatpush.msra.mxu0 %v880_v55 }
 0x35c   : > { %888 = vmatpush.msra.mxu0 %v879_v56 }
 0x35e   : > { %889 = vmatpush.msra.mxu0 %v878_v57 }
 0x360   : > { %890 = vmatpush.msra.mxu0 %v877_v58 }
 0x362   : > { %891 = vmatpush.msra.mxu0 %v876_v59 }
 0x364   : > { %892 = vmatpush.msra.mxu0 %v875_v60 }
 0x366   : > { %893 = vmatpush.msra.mxu0 %v874_v61 }
 0x368   : > { %894 = vmatpush.msra.mxu0 %v873_v62 }
 0x36a   : > { %895 = vmatpush.msra.mxu0 %v872_v63 }
 0x36c   : > { %896 = vmatpush.msra.mxu0 %v871_v0 }
 0x36e   : > { %897 = vmatpush.msra.mxu0 %v870_v1 }
 0x370   : > { %898 = vmatpush.msra.mxu0 %v869_v2 }
 0x372   : > { %899 = vmatpush.msra.mxu0 %v868_v3 }
 0x373   : > { %900 = vmatmul.f32.vlgmr.msra.gmra.mxu0 %v867_v4 }
 0x3f0   : > { %v901_v7 = vpop.f32.mrf.mxu0 }
 0x3f1   : > { %v904_v8 = vadd.f32 %v901_v7, %v866_v6 }
 0x3f3   : > { %905 = vst [vmem:[%s407_s25] sm:$0x3] %v904_v8 }
 0x3f4 PF: > { %s2053_s27 = sld [smem:[#allocation33_spill]]  ;;  %s919_s7 = sshll.u32 %s407_s25, 4  ;;  %s920_s7 = int_to_ptr.vmem [resolvable:$true] %s919_s7 }
 0x3f5   : > { %s907_s5 = scalar_lea.sflag [#allocation6], %s405_s13 }
 0x3fa   : > { %s2054_s22 = smov %s2053_s27  ;;  %s917_s4 = scalar_lea.hbm %s2053_s27, %s1089_s16 }
 0x3fb   : > { %s921_s11 = sshll.u32 %s917_s4, 4  ;;  %s1466_s8 = scalar_lea.hbm %s2054_s22, 4  ;;  %s922_s11 = int_to_ptr.hbm [resolvable:$true] %s921_s11 }
 0x3fc   : > { %s1460_s28 = sshra.s32 %s922_s11, 4  ;;  %s1461_s28 = int_to_ptr.hbm [resolvable:$true] %s1460_s28 }
 0x3fd   : > { %s1462_s23 = scalar_lea.hbm %s1461_s28, 2  ;;  %p1467_p8 = scmp.lt.s32.totalorder %s1461_s28, %s2054_s22 }
 0x3fe   : > { %p1463_p4 = scmp.ne.s32.totalorder %s1461_s28, %s1462_s23  ;;  %p1468_p10 = scmp.lt.s32.totalorder %s1466_s8, %s1462_s23 }
 0x400   : > { %p1464_p5 = pnand %p1463_p4, %p1713_p7  ;;  %p1469_p12 = por %p1468_p10, %p1467_p8 }
 0x402   : > { %p1465_p6 = pneg %p1464_p5 }
 0x404   : > { %p1470_p13 = pnand %p1469_p12, %p1465_p6 }
 0x406   : > { %1473 = shalt.err (!%p1470_p13)
}
 0x407   : > { %1159 = dma.vmem_to_hbm [thread:$0]  (%p1713_p7), %s920_s7, 32, %s922_s11, %s907_s5  }
 0x408 PF: > { %s2057_s13 = sld [smem:[#allocation19_spill]]  ;;  %p1191_p11 = scmp.ge.s32.totalorder %s1580_s15, 2 }
 0x40a   : > { %p1179_p3 = pnand %p1191_p11, %p1718_p9 }
 0x40c   : > { %p1180_p0 = pneg %p1179_p3 }
 0x40e   : > { %s933_s25 = sand.u32 1, %s2057_s13  }
 0x40f   : > { %s934_s12 = scalar_lea.sflag [#allocation6], %s933_s25 }
 0x410   : > { %1535 = dma.done.wait (%p1180_p0), %s934_s12, 32  }
 0x411   : > { %1537 = vsyncadd (%p1180_p0), %s934_s12, 4294967264  ;;  %s26_s15 = sadd.s32 1, %s1580_s15   ;;  %s2059_s27 = sld [smem:[#allocation20_spill]] }
 0x412   : > { %p23_p1 = scmp.ge.s32.totalorder %s26_s15, 6   ;;  %s2060_s11 = sld [smem:[#allocation23_spill]] }
 0x413   : > { %s2061_s20 = smov %s2075_s30  ;;  %s2062_s28 = smov %s1548_s29 }
 0x414   : > { %s2063_s29 = smov %s1788_s0  ;;  %s2064_s30 = smov %s1556_s9 }
 0x415   : > { %s2065_s9 = smov %s1560_s10  ;;  %s2066_s10 = smov %s1791_s6 }
 0x416   : > { %s2067_s12 = smov %s1576_s14  ;;  %s2068_s13 = smov %s2071_s21 }
 0x417   : > { %s2069_s14 = smov %s2061_s20  ;;  %25 = sbr.rel (!%p23_p1) target bundleno = 20 (0x14), region = 127 }
 0x41c   :  { %940 = vsyncpa [#allocation5], 1 }
 0x41d   :  { %942 = vsyncpa [#allocation5 + $0x1], 1 }
 0x41e   :  { %943 = vsyncpa [#allocation8], 1 }
 0x41f   :  { %945 = vsyncpa [#allocation8 + $0x1], 1 }
 0x420   :  { %946 = vsyncpa [#allocation11], 1 }
 0x421   :  { %947 = vsyncpa [#allocation6], 1 }
 0x422   :  { %949 = vsyncpa [#allocation6 + $0x1], 1 }

</bundles_post_ra>
